<compile_context>
chip_gen: v5e
topology: v5e:2x2
jax: 0.10.0
libtpu: 0.0.40
codegen_flags: <defaults>
</compile_context>

<pallas_src>
import jax
import jax.numpy as jnp
from jax.experimental import pallas as pl
from jax.experimental.pallas import tpu as pltpu


_SUBLANE = 8
_LANE = 128
# Per-block byte budget.  With double-buffered input + double-buffered output
# (4 live buffers) this is 32 MiB of VMEM, inside the explicit 48 MiB limit
# below and under v7x's 64 MiB physical VMEM, while blocks are big enough to
# amortize the ~0.35 us per-grid-step overhead on every generation.
_TARGET_BLOCK_BYTES = 8 * 1024 * 1024
_VMEM_LIMIT_BYTES = 48 << 20


# ----------------------------------------------------------------------------
# Pallas scaffold kernel (the slot a concrete criterion's loss math goes in).
# ----------------------------------------------------------------------------
def _criterion_scaffold_kernel(in_ref, tgt_hbm_ref, out_ref):
    # TODO(synk): BaseCriterion.forward is abstract (raises NotImplementedError);
    # there is no loss computation to port.  A concrete subclass replaces this
    # body with its loss, following this scaffold:
    #   * switch `targets` from memory_space=pl.ANY to a tiled VMEM BlockSpec
    #     (re-budget blocks for TWO double-buffered operands -> halve the
    #     per-operand block size chosen here),
    #   * add a trailing "arbitrary" reduction grid axis with a lane-padded
    #     float32 accumulator in pltpu.VMEM scratch, init under
    #     pl.when(pl.program_id(last) == 0), finalize under
    #     pl.when(pl.program_id(last) == num_programs(last) - 1),
    #   * keep bf16 elementwise math on v6e/v7x and upcast only the
    #     accumulator; upcast inside the kernel on v5e.
    del tgt_hbm_ref  # never read by the abstract base; stays in HBM, no DMA
    out_ref[...] = in_ref[...]


def _choose_tiles(rows, cols, itemsize, budget=_TARGET_BLOCK_BYTES):
    """Pick (tm, tn) block dims.

    - Row tile aligned to the dtype's sublane packing (8/16/32 rows per vreg).
    - Column tile defaults to the FULL width (lane-dense stores; also exempts
      non-multiple-of-128 widths from the (8,128) rule).  Columns are only
      split when a single packing-aligned slab of full width would blow the
      block budget, and then in large multiples of 128 lanes.
    """
    row_align = max(_SUBLANE, _SUBLANE * (4 // max(1, itemsize)))

    if cols % _LANE == 0 and row_align * cols * itemsize > budget:
        tn = (budget // (row_align * itemsize)) // _LANE * _LANE
        tn = max(_LANE * 8, tn)          # keep stores lane-dense (>=1024 lanes)
        tn = min(tn, cols)
    else:
        tn = cols                        # full extent: always legal

    tm = budget // max(1, tn * itemsize)
    tm = min(tm, rows)
    if rows >= row_align:
        tm = max(row_align, (tm // row_align) * row_align)
    else:
        tm = rows                        # full extent: exempt from the 8-rule
    return tm, tn


def _run_criterion_scaffold(inputs, targets, *, force_kernel=False):
    """Scaffold runner.

    The abstract base performs no computation, so by default this
    SHORT-CIRCUITS and returns `inputs` with zero HBM traffic.  Passing
    force_kernel=True executes the (identity) Pallas scaffold once — useful
    only to validate that the kernel a subclass would fill in compiles and
    runs on the target chip.
    """
    if not force_kernel:
        return inputs                    # no-op path: no pallas_call, no DMA

    orig_shape = inputs.shape
    B, C, H, W = orig_shape
    rows, cols = B * C, H * W            # H*W lands on the 128-wide lane axis
    x2 = inputs.reshape(rows, cols)      # metadata-only reshape

    tm, tn = _choose_tiles(rows, cols, x2.dtype.itemsize)
    grid = (pl.cdiv(rows, tm), pl.cdiv(cols, tn))

    out2 = pl.pallas_call(
        _criterion_scaffold_kernel,
        out_shape=jax.ShapeDtypeStruct((rows, cols), x2.dtype),
        grid_spec=pltpu.PrefetchScalarGridSpec(
            num_scalar_prefetch=0,
            grid=grid,
            in_specs=[
                # inputs: 2-D row/col tiling, auto double-buffered; partial
                # boundary blocks handled by Pallas (no wrapper-side padding).
                pl.BlockSpec((tm, tn), lambda i, j: (i, j)),
                # targets: raw HBM ref, untouched and never DMA'd.
                pl.BlockSpec(memory_space=pl.ANY),
            ],
            out_specs=pl.BlockSpec((tm, tn), lambda i, j: (i, j)),
        ),
        compiler_params=pltpu.CompilerParams(
            # Both axes independent -> shardable across v7x's two TCs;
            # harmless on single-TC v5e/v6e.
            dimension_semantics=("parallel", "parallel"),
            vmem_limit_bytes=_VMEM_LIMIT_BYTES,
        ),
    )(x2, targets)

    return out2.reshape(orig_shape)


# ----------------------------------------------------------------------------
# Faithful port of the PyTorch module.
# ----------------------------------------------------------------------------
class BaseCriterion:
    """Abstract criterion base class (JAX/Pallas port).

    Matches the PyTorch module exactly: no parameters are created in __init__,
    and forward() raises NotImplementedError.
    """

    def __init__(self):
        # The PyTorch __init__ registers no parameters/buffers; nothing to init.
        pass

    def forward(self, inputs, targets):
        raise NotImplementedError(
            "Each criterion must implement the forward method."
        )

    def __call__(self, inputs, targets):
        return self.forward(inputs, targets)


if __name__ == "__main__":
    key = jax.random.PRNGKey(0)
    k_in, k_tgt = jax.random.split(key)

    B, C, H, W = 2, 4, 16, 16  # small NCHW shapes, consistent with a criterion
    inputs = jax.random.normal(k_in, (B, C, H, W), dtype=jnp.float32)
    targets = jax.random.normal(k_tgt, (B, C, H, W), dtype=jnp.float32)

    # 1) Exact forward semantics: the base criterion must raise.
    crit = BaseCriterion()
    raised = False
    try:
        crit(inputs, targets)
    except NotImplementedError:
        raised = True
    assert raised, "BaseCriterion.forward must raise NotImplementedError"

    # 2) Default (recommended) path: short-circuit — no kernel, no HBM traffic.
    passthrough = _run_criterion_scaffold(inputs, targets)
    assert passthrough is inputs

    # 3) Run the Pallas scaffold kernel once (the hook a subclass would fill).
    out = _run_criterion_scaffold(inputs, targets, force_kernel=True)
    out = jax.block_until_ready(out)

    # Sanity: identity pass-through, back in NCHW.
    assert out.shape == inputs.shape
    assert jnp.allclose(out, inputs)

    print("KERNEL_OK")
</pallas_src>

<mosaic_0001>
module attributes {stable_mosaic.version = 11 : i64} {
  func.func @_criterion_scaffold_kernel(%arg0: i32, %arg1: i32, %arg2: memref<8x256xf32, #tpu.memory_space<vmem>>, %arg3: memref<2x4x16x16xf32, #tpu.memory_space<any>>, %arg4: memref<8x256xf32, #tpu.memory_space<vmem>>) attributes {dimension_semantics = [#tpu.dimension_semantics<parallel>, #tpu.dimension_semantics<parallel>], iteration_bounds = array<i64: 1, 1>, scalar_prefetch = 0 : i64, scratch_operands = 0 : i64, tpu.core_type = #tpu.core_type<tc>, window_params = [{transform_indices = @transform_0, window_bounds = array<i64: 8, 256>}, {}, {transform_indices = @transform_2, window_bounds = array<i64: 8, 256>}]} {
    %c0 = arith.constant 0 : index
    %c0_0 = arith.constant 0 : index
    %0 = vector.load %arg2[%c0, %c0_0] : memref<8x256xf32, #tpu.memory_space<vmem>>, vector<8x256xf32>
    %c0_1 = arith.constant 0 : index
    %c0_2 = arith.constant 0 : index
    %1 = vector.load %arg4[%c0_1, %c0_2] : memref<8x256xf32, #tpu.memory_space<vmem>>, vector<8x256xf32>
    tpu.vector_store %arg4[%c0_1, %c0_2], %0 {strides = array<i32>} : memref<8x256xf32, #tpu.memory_space<vmem>>, vector<8x256xf32>,
    return
  }
  func.func @transform_0(%arg0: i32, %arg1: i32) -> (i32, i32) {
    %c0_i32 = arith.constant 0 : i32
    return %arg0, %arg1 : i32, i32
  }
  func.func @transform_2(%arg0: i32, %arg1: i32) -> (i32, i32) {
    %c0_i32 = arith.constant 0 : i32
    return %arg0, %arg1 : i32, i32
  }
}

</mosaic_0001>

<bundles_post_ra>
// kernel: tpu_custom_call.1
= control target key start
LH: loop header
LB: loop body
LE: loop exit
PB: predicated region body
PF: predicated region fallthrough
CT: control target
= control target key end

     0   :  { %7 = vsyncpa [#allocation3], 0  ;;  %s122_s0 = inlined_call_operand.hbm [shape: f32[8,256], index: 0, kind: input, shape index: {}]   ;;  %s123_s1 = inlined_call_operand.hbm [shape: f32[2,4,16,16], index: 1, kind: input, shape index: {}]   ;;  %s124_s2 = inlined_call_operand.hbm [shape: f32[8,256], index: 2, kind: output, shape index: {}]  }
   0x1   :  { %8 = vsyncpa [#allocation4], 0  ;;  %s14_s11 = sshll.u32 %s122_s0, 4  ;;  %s99_s12 = smov [#allocation2]   ;;  %s15_s11 = int_to_ptr.hbm [resolvable:$true] %s14_s11 }
   0x2   :  { %s16_s13 = sshll.u32 %s99_s12, 4  ;;  %s17_s13 = int_to_ptr.vmem [resolvable:$true] %s16_s13 }
   0x3   :  { %19 = dma.hbm_to_vmem [thread:$0]  %s15_s11, 256, %s17_s13, [#allocation3]  }
   0x4   :  { %95 = dma.done.wait [#allocation3], 256  }
   0x5   :  { %96 = vsyncadd [#allocation3], 4294967040  ;;  %s100_s14 = smov [#allocation5]   ;;  %s35_s17 = sshll.u32 %s124_s2, 4  ;;  %v24_v0 = vld [vmem:[#allocation2] sm:$0xff]  ;;  %v25_v1 = vld [vmem:[#allocation2 + $0x8] sm:$0xff]  ;;  %s36_s17 = int_to_ptr.hbm [resolvable:$true] %s35_s17 }
   0x6   :  { %s33_s15 = sshll.u32 %s100_s14, 4  ;;  %26 = vst [vmem:[#allocation5] sm:$0xff] %v24_v0  ;;  %s34_s15 = int_to_ptr.vmem [resolvable:$true] %s33_s15 }
   0x7   :  { %27 = vst [vmem:[#allocation5 + $0x8] sm:$0xff] %v25_v1 }
   0x8   :  { %38 = dma.vmem_to_hbm [thread:$0]  %s34_s15, 256, %s36_s17, [#allocation4]  }
   0x9   :  { %97 = dma.done.wait [#allocation4], 256  }
   0xa   :  { %98 = vsyncadd [#allocation4], 4294967040 }
   0xb   :  { %43 = vsyncpa [#allocation3], 1 }
   0xc   :  { %44 = vsyncpa [#allocation4], 1 }

</bundles_post_ra>
